<compile_context>
chip_gen: v7x
topology: tpu7x:2x2x1
jax: 0.10.0
libtpu: 0.0.40
codegen_flags: <defaults>
</compile_context>

<pallas_src>
import functools

import jax
import jax.numpy as jnp
from jax.experimental import pallas as pl
from jax.experimental.pallas import tpu as pltpu


def _mse_one_hot_kernel(pred_ref, labels_ref, out_ref, acc_ref, *,
                        n_total, n_classes, block_rows):
    i = pl.program_id(0)

    @pl.when(i == 0)
    def _init():
        acc_ref[0, 0] = jnp.float32(0.0)

    pred = pred_ref[...].astype(jnp.float32)      # (TN, C)
    labels = labels_ref[...]                      # (TN, 1) int32
    tn, c = pred.shape

    # Numerically stable softmax; single full-tile exp, reciprocal on the (TN,1) sum.
    row_max = jnp.max(pred, axis=1, keepdims=True)             # (TN, 1)
    exp_shifted = jnp.exp(pred - row_max)                       # (TN, C)
    sum_exp = jnp.sum(exp_shifted, axis=1, keepdims=True)       # (TN, 1)
    sm = exp_shifted * pl.reciprocal(sum_exp, approx=False)     # softmax rows

    # one_hot(labels) via iota compare (never materialized outside the kernel).
    cls_iota = jax.lax.broadcasted_iota(jnp.int32, (tn, c), 1)
    diff = sm - jnp.where(cls_iota == labels, 1.0, 0.0)
    row_sq = jnp.sum(diff * diff, axis=1, keepdims=True)        # (TN, 1)

    # Mask padded rows of the tail tile (global row index >= N).
    row_ids = i * block_rows + jax.lax.broadcasted_iota(jnp.int32, (tn, 1), 0)
    row_sq = jnp.where(row_ids < n_total, row_sq, 0.0)

    acc_ref[0, 0] += jnp.sum(row_sq)

    @pl.when(i == pl.num_programs(0) - 1)
    def _finalize():
        out_ref[0, 0] = acc_ref[0, 0] * jnp.float32(1.0 / (n_total * n_classes))
        # TODO(synk): on v7x, emit per-tile partials and reduce in the wrapper so the
        # grid axis can be 'parallel' across both TensorCores.


def mse_one_hot_loss(pred, labels, *, block_rows=None):
    """pred: (N, C) logits (f32 or bf16); labels: (N,) int. Returns scalar loss."""
    n, c = pred.shape
    labels2d = labels.astype(jnp.int32).reshape(n, 1)

    if block_rows is None:
        # Largest row tile whose double-buffered pred block stays around ~8 MiB,
        # comfortably inside scoped VMEM on every generation (v7x only has 64 MiB).
        bytes_per_row = 2 * c * jnp.dtype(pred.dtype).itemsize
        block_rows = (8 * 1024 * 1024) // max(1, bytes_per_row)
        block_rows = max(8, min(block_rows, 2048, n))
    if n >= 8:
        block_rows = max(8, (min(block_rows, n) // 8) * 8)   # sublane multiple of 8
    else:
        block_rows = n                                        # full-dim block
    num_tiles = pl.cdiv(n, block_rows)

    kernel = functools.partial(_mse_one_hot_kernel, n_total=n, n_classes=c,
                               block_rows=block_rows)

    out = pl.pallas_call(
        kernel,
        out_shape=jax.ShapeDtypeStruct((1, 1), jnp.float32),
        grid=(num_tiles,),
        in_specs=[
            pl.BlockSpec((block_rows, c), lambda i: (i, 0)),   # logits tile (VMEM)
            pl.BlockSpec((block_rows, 1), lambda i: (i, 0)),   # labels tile (VMEM)
        ],
        out_specs=pl.BlockSpec(memory_space=pltpu.MemorySpace.SMEM),
        scratch_shapes=[pltpu.SMEM((1, 1), jnp.float32)],
        compiler_params=pltpu.CompilerParams(
            dimension_semantics=("arbitrary",)),
    )(pred, labels2d)
    return out[0, 0]


def _mse_one_hot_ref(pred, labels):
    # pure-JAX reference matching the PyTorch module
    sm = jax.nn.softmax(pred.astype(jnp.float32), axis=1)
    oh = jax.nn.one_hot(labels, pred.shape[1], dtype=jnp.float32)
    return jnp.mean((sm - oh) ** 2)


if __name__ == "__main__":
    key = jax.random.PRNGKey(0)
    k1, k2, k3, k4 = jax.random.split(key, 4)

    # Case 1: canonical classification shape (batch=8, num_classes=10).
    N, C = 8, 10
    pred = jax.random.normal(k1, (N, C), dtype=jnp.float32)
    labels = jax.random.randint(k2, (N,), 0, C, dtype=jnp.int32)
    loss = jax.block_until_ready(mse_one_hot_loss(pred, labels))
    ref = _mse_one_hot_ref(pred, labels)
    assert jnp.allclose(loss, ref, rtol=1e-5, atol=1e-6), (loss, ref)

    # Case 2: batch not a multiple of the row tile (exercises tail masking).
    N2, C2 = 12, 37
    pred2 = jax.random.normal(k3, (N2, C2), dtype=jnp.float32)
    labels2 = jax.random.randint(k4, (N2,), 0, C2, dtype=jnp.int32)
    loss2 = jax.block_until_ready(mse_one_hot_loss(pred2, labels2, block_rows=8))
    ref2 = _mse_one_hot_ref(pred2, labels2)
    assert jnp.allclose(loss2, ref2, rtol=1e-5, atol=1e-6), (loss2, ref2)

    print("KERNEL_OK")
</pallas_src>

<mosaic_0001>
module attributes {stable_mosaic.version = 11 : i64} {
  func.func @_mse_one_hot_kernel(%arg0: i32, %arg1: memref<8x10xf32, #tpu.memory_space<vmem>>, %arg2: memref<8x1xi32, #tpu.memory_space<vmem>>, %arg3: memref<1x1xf32, #tpu.memory_space<smem>>, %arg4: memref<1x1xf32, #tpu.memory_space<smem>>) attributes {dimension_semantics = [#tpu.dimension_semantics<arbitrary>], iteration_bounds = array<i64: 1>, scalar_prefetch = 0 : i64, scratch_operands = 1 : i64, tpu.core_type = #tpu.core_type<tc>, window_params = [{transform_indices = @transform_0, window_bounds = array<i64: 8, 10>}, {transform_indices = @transform_1, window_bounds = array<i64: 8, 1>}, {transform_indices = @transform_2, window_bounds = array<i64: 1, 1>}]} {
    %c0_i32 = arith.constant 0 : i32
    %0 = arith.cmpi eq, %arg0, %c0_i32 : i32
    %1 = arith.extui %0 : i1 to i32
    %c0_i32_0 = arith.constant 0 : i32
    %2 = arith.cmpi ne, %1, %c0_i32_0 : i32
    scf.if %2 {
      %cst_17 = arith.constant 0.000000e+00 : f32
      %c0_18 = arith.constant 0 : index
      %c0_19 = arith.constant 0 : index
      %43 = memref.load %arg4[%c0_18, %c0_19] : memref<1x1xf32, #tpu.memory_space<smem>>
      memref.store %cst_17, %arg4[%c0_18, %c0_19] : memref<1x1xf32, #tpu.memory_space<smem>>
    } else {
    }
    %c0 = arith.constant 0 : index
    %c0_1 = arith.constant 0 : index
    %3 = vector.load %arg1[%c0, %c0_1] : memref<8x10xf32, #tpu.memory_space<vmem>>, vector<8x10xf32>
    %c0_2 = arith.constant 0 : index
    %c0_3 = arith.constant 0 : index
    %4 = vector.load %arg2[%c0_2, %c0_3] : memref<8x1xi32, #tpu.memory_space<vmem>>, vector<8x1xi32>
    %cst = arith.constant dense<0xFF800000> : vector<8xf32>
    %5 = vector.multi_reduction <maximumf>, %3, %cst [1] : vector<8x10xf32> to vector<8xf32>
    %6 = vector.shape_cast %5 : vector<8xf32> to vector<8x1xf32>
    %7 = vector.broadcast %6 : vector<8x1xf32> to vector<8x10xf32>
    %8 = arith.subf %3, %7 : vector<8x10xf32>
    %9 = math.exp %8 : vector<8x10xf32>
    %cst_4 = arith.constant dense<0.000000e+00> : vector<8xf32>
    %10 = vector.multi_reduction <add>, %9, %cst_4 [1] : vector<8x10xf32> to vector<8xf32>
    %11 = vector.shape_cast %10 : vector<8xf32> to vector<8x1xf32>
    %12 = tpu.reciprocal %11 : vector<8x1xf32> -> vector<8x1xf32>
    %13 = vector.broadcast %12 : vector<8x1xf32> to vector<8x10xf32>
    %14 = arith.mulf %9, %13 : vector<8x10xf32>
    %15 = tpu.iota {dimensions = array<i32: 1>} : vector<8x10xi32>
    %16 = vector.broadcast %4 : vector<8x1xi32> to vector<8x10xi32>
    %17 = arith.cmpi eq, %15, %16 : vector<8x10xi32>
    %cst_5 = arith.constant 1.000000e+00 : f32
    %cst_6 = arith.constant 0.000000e+00 : f32
    %18 = vector.broadcast %cst_5 : f32 to vector<8x10xf32>
    %19 = vector.broadcast %cst_6 : f32 to vector<8x10xf32>
    %20 = arith.select %17, %18, %19 : vector<8x10xi1>, vector<8x10xf32>
    %21 = arith.subf %14, %20 : vector<8x10xf32>
    %22 = arith.mulf %21, %21 : vector<8x10xf32>
    %cst_7 = arith.constant dense<0.000000e+00> : vector<8xf32>
    %23 = vector.multi_reduction <add>, %22, %cst_7 [1] : vector<8x10xf32> to vector<8xf32>
    %24 = vector.shape_cast %23 : vector<8xf32> to vector<8x1xf32>
    %c8_i32 = arith.constant 8 : i32
    %25 = arith.muli %arg0, %c8_i32 : i32
    %26 = tpu.iota {dimensions = array<i32: 0>} : vector<8x1xi32>
    %27 = vector.broadcast %25 : i32 to vector<8x1xi32>
    %28 = arith.addi %27, %26 : vector<8x1xi32>
    %c8_i32_8 = arith.constant 8 : i32
    %29 = vector.broadcast %c8_i32_8 : i32 to vector<8x1xi32>
    %30 = arith.cmpi slt, %28, %29 : vector<8x1xi32>
    %cst_9 = arith.constant 0.000000e+00 : f32
    %31 = vector.broadcast %cst_9 : f32 to vector<8x1xf32>
    %32 = arith.select %30, %24, %31 : vector<8x1xi1>, vector<8x1xf32>
    %c0_10 = arith.constant 0 : index
    %c0_11 = arith.constant 0 : index
    %33 = memref.load %arg4[%c0_10, %c0_11] : memref<1x1xf32, #tpu.memory_space<smem>>
    %34 = vector.shape_cast %32 : vector<8x1xf32> to vector<1x8x1xf32>
    %cst_12 = arith.constant dense<0.000000e+00> : vector<1xf32>
    %35 = vector.multi_reduction <add>, %34, %cst_12 [1, 2] : vector<1x8x1xf32> to vector<1xf32>
    %36 = vector.shape_cast %35 : vector<1xf32> to vector<1x1x1xf32>
    %37 = vector.extract %36[0, 0, 0] : f32 from vector<1x1x1xf32>
    %38 = arith.addf %33, %37 : f32
    %c0_13 = arith.constant 0 : index
    %c0_14 = arith.constant 0 : index
    %39 = memref.load %arg4[%c0_13, %c0_14] : memref<1x1xf32, #tpu.memory_space<smem>>
    memref.store %38, %arg4[%c0_13, %c0_14] : memref<1x1xf32, #tpu.memory_space<smem>>
    %c0_i32_15 = arith.constant 0 : i32
    %40 = arith.cmpi eq, %arg0, %c0_i32_15 : i32
    %41 = arith.extui %40 : i1 to i32
    %c0_i32_16 = arith.constant 0 : i32
    %42 = arith.cmpi ne, %41, %c0_i32_16 : i32
    scf.if %42 {
      %c0_17 = arith.constant 0 : index
      %c0_18 = arith.constant 0 : index
      %43 = memref.load %arg4[%c0_17, %c0_18] : memref<1x1xf32, #tpu.memory_space<smem>>
      %cst_19 = arith.constant 1.250000e-02 : f32
      %44 = arith.mulf %43, %cst_19 : f32
      %c0_20 = arith.constant 0 : index
      %c0_21 = arith.constant 0 : index
      %45 = memref.load %arg3[%c0_20, %c0_21] : memref<1x1xf32, #tpu.memory_space<smem>>
      memref.store %44, %arg3[%c0_20, %c0_21] : memref<1x1xf32, #tpu.memory_space<smem>>
    } else {
    }
    return
  }
  func.func @transform_0(%arg0: i32) -> (i32, i32) {
    %c0_i32 = arith.constant 0 : i32
    %c0_i32_0 = arith.constant 0 : i32
    return %arg0, %c0_i32 : i32, i32
  }
  func.func @transform_1(%arg0: i32) -> (i32, i32) {
    %c0_i32 = arith.constant 0 : i32
    %c0_i32_0 = arith.constant 0 : i32
    return %arg0, %c0_i32 : i32, i32
  }
  func.func @transform_2(%arg0: i32) -> (i32, i32) {
    %c0_i32 = arith.constant 0 : i32
    %c0_i32_0 = arith.constant 0 : i32
    %c0_i32_1 = arith.constant 0 : i32
    return %c0_i32, %c0_i32_0 : i32, i32
  }
}

</mosaic_0001>

<bundles_post_ra>
// kernel: tpu_custom_call.1
= control target key start
LH: loop header
LB: loop body
LE: loop exit
PB: predicated region body
PF: predicated region fallthrough
CT: control target
= control target key end

     0   :  { %vm20_vm0 = vcmask 80896   ;;  %s148_s0 = inlined_call_operand.vmem [shape: f32[8,10], index: 0, kind: input, shape index: {}]   ;;  %s149_s1 = inlined_call_operand.vmem [shape: s32[8,1], index: 1, kind: input, shape index: {}]   ;;  %s150_s2 = inlined_call_operand.hbm [shape: f32[1,1], index: 2, kind: output, shape index: {}]  }
   0x1   :  { %v18_v0 = vld [vmem:[%s148_s0] sm:$0xff] }
   0x2   :  { %7 = vsyncpa [#allocation4], 0  ;;  %v21_v1 = vsel %vm20_vm0, %v18_v0, -inf  ;;  %v19_v2 = vld [vmem:[%s149_s1] sm:$0xff]  ;;  %v109_v3 = vmov 0   ;;  %v32_v10 = vlaneseq  ;;  %v110_v14 = vmov 0.0  }
   0x3   :  { %22 = vmax.xlane.f32.xlu0 %v21_v1  ;;  %91 = vset.pattern.permute.xlu1 %v109_v3  ;;  %vm52_vm2 = vcmask 7168   ;;  %s97_s15 = scalar_lea.hbm %s150_s2, 16 }
   0x4   :  { %92 = vset.pattern.permute.xlu0 %v109_v3  ;;  %35 = vperm.xlu1 %91, %v19_v2   ;;  %v33_v11 = vand.u32 127, %v32_v10  ;;  %p98_p0 = scmp.ne.s32.totalorder %s150_s2, %s97_s15  ;;  %p101_p1 = scmp.lt.u32.totalorder %s97_s15, %s150_s2 }
   0x6   :  { %p103_p2 = pnand %p101_p1, %p98_p0 }
  0x83   :  { %v36_v12 = vpop.permute.xlu1 %35 }
  0x84   :  { %vm37_vm1 = vcmp.eq.s32.totalorder %v33_v11, %v36_v12 }
  0x85   :  { %v38_v15 = vsel %vm37_vm1, 1.0, %v110_v14 }
  0x90   :  { %v23_v4 = vpop.xlane.xlu0 %22 }
  0x91   :  { %v24_v5 = vsub.f32 %v18_v0, %v23_v4 }
  0x93   :  { %v25_v6 = vmul.f32 1.442695, %v24_v5 }
  0x95   :  { %93 = vpow2.f32 %v25_v6 }
  0x9f   :  { %v94_v7 = vpop.eup %93 }
  0xa0   :  { %v27_v8 = vsel %vm20_vm0, %v94_v7, 0.0 }
  0xa1   :  { %28 = vadd.xlane.f32.xlu0 %v27_v8 }
 0x12e   :  { %v29_v9 = vpop.xlane.xlu0 %28 }
 0x12f   :  { %95 = vrcp.f32 %v29_v9 }
 0x139   :  { %v96_v13 = vpop.eup %95 }
 0x13a   :  { %v31_v16 = vmul.f32 %v96_v13, %v94_v7 }
 0x13c   :  { %v39_v17 = vsub.f32 %v31_v16, %v38_v15 }
 0x13e   :  { %v40_v18 = vmul.f32 %v39_v17, %v39_v17 }
 0x140   :  { %v41_v19 = vsel %vm20_vm0, %v40_v18, 0.0 }
 0x141   :  { %42 = vadd.xlane.f32.xlu1 %v41_v19 }
 0x1ce   :  { %v43_v20 = vpop.xlane.xlu1 %42 }
 0x1cf   :  { %v53_v21 = vsel %vm52_vm2, %v43_v20, 0.0 }
 0x1d0   :  { %54 = vadd.xlane.f32.xlu0 %v53_v21 }
 0x25d   :  { %v55_v22 = vpop.xlane.xlu0 %54 }
 0x25e   :  { %v56_v23 = vrot.slane %v55_v22, 4 }
 0x260   :  { %v57_v24 = vadd.f32 %v56_v23, %v55_v22 }
 0x262   :  { %v58_v25 = vrot.slane %v57_v24, 2 }
 0x264   :  { %v59_v26 = vadd.f32 %v58_v25, %v57_v24 }
 0x266   :  { %v60_v27 = vrot.slane %v59_v26, 1 }
 0x268   :  { %v61_v28 = vadd.f32 %v60_v27, %v59_v26 }
 0x26a   :  { %86 = vpush %v61_v28 }
 0x29b   :  { %s87_s0 = spop %86 }
 0x29c   :  { %s70_s1 = smul.f32 0.0125, %s87_s0 }
 0x29e   :  { %72 = sst [smem:[#allocation3]] %s70_s1 }
 0x29f   :  { %106 = shalt.err (!%p103_p2)
}
 0x2a0   :  { %s111_s20 = smov [#allocation3]  }
 0x2a1   :  { %80 = dma.smem_to_hbm %s111_s20, 16, %s150_s2, [#allocation4]  }
 0x2a2   :  { %107 = dma.done.wait [#allocation4], 16  }
 0x2a3   :  { %108 = vsyncadd [#allocation4], 4294967280 }
 0x2a4   :  { %84 = sfence }
 0x2a5   :  { %85 = vsyncpa [#allocation4], 1 }

</bundles_post_ra>
